<compile_context>
chip_gen: v5e
topology: v5e:2x2
jax: 0.10.0
libtpu: 0.0.40
codegen_flags: <defaults>
</compile_context>

<pallas_src>
import functools

import jax
import jax.numpy as jnp
from jax.experimental import pallas as pl
from jax.experimental.pallas import tpu as pltpu


def _round_up(x: int, m: int) -> int:
    return ((x + m - 1) // m) * m


def _vmem_budgets():
    """(tile_budget_bytes, vmem_limit_bytes) sized from the actual chip.

    v5e/v6e (128 MiB VMEM) -> limit 96 MiB, tile budget ~57 MiB.
    v7x (64 MiB per TC)    -> limit 48 MiB, tile budget ~28 MiB.
    Falls back to a conservative 64 MiB cap if the query is unavailable.
    """
    try:
        cap = getattr(pltpu.get_tpu_info(), "vmem_capacity_bytes", 128 << 20)
    except Exception:
        cap = 64 << 20
    limit = max(32 << 20, min(cap - (16 << 20), 96 << 20))  # headroom for Mosaic scratch
    budget = min(int(limit * 0.6), 64 << 20)
    return budget, limit


def _pick_hw_tile(hw: int, b: int, m: int, c: int, hd: int,
                  stream_bytes: int, out_bytes: int, budget_bytes: int,
                  max_tile: int = 8192) -> int:
    """Largest lane tile (multiple of 128, <= max_tile) fitting a VMEM budget.

    per_lane counts double-buffered streamed tiles (x, mask), the double-buffered
    output tile, and a conservative allowance for f32 temporaries (f32 casts of
    the streamed blocks plus the per-measurement MAC intermediates, which the
    unrolled loop may keep live).
    """
    hw128 = _round_up(hw, 128)
    per_lane = (
        2 * (b * c + m * c) * stream_bytes          # x + mask streams, double buffered
        + 2 * b * c * out_bytes                     # output tile, double buffered
        + (b * c + 4 * m * c + 2 * c + hd + 4) * 4  # f32 temporaries (conservative)
    )
    tile = (budget_bytes // per_lane) // 128 * 128
    return max(128, min(tile, max_tile, hw128))


def _ssl_kernel(x_ref, mask_ref, w1_ref, b1_ref, w2_ref, b2_ref, out_ref,
                *, num_meas: int, batch: int):
    """One spatial-tile grid step (whole batch processed per step).

    x_ref    : (B, C,  T)  hyperspectral cube tile (stream dtype)
    mask_ref : (M, C,  T)  spectral filter mask tile (stream dtype, batch-invariant)
    w1_ref   : (Hd, C)     1x1-conv #1 weight (pad columns pre-sliced, MXU dtype)
    b1_ref   : (Hd, 1)     1x1-conv #1 bias (f32)
    w2_ref   : (C, Hd)     1x1-conv #2 weight (pad rows pre-sliced, MXU dtype)
    b2_ref   : (C, 1)      1x1-conv #2 bias (f32)
    out_ref  : (B, C,  T)  fused SSL output tile
    """
    w1 = w1_ref[...]
    w2 = w2_ref[...]
    b1 = b1_ref[...].astype(jnp.float32)
    b2 = b2_ref[...].astype(jnp.float32)

    for b in range(batch):                                   # B is small -> unroll
        x_b = x_ref[b].astype(jnp.float32)                   # (C, T)

        # --- model1: measurement + adjoint fused in one pass over the mask ---
        #   y[m]   = sum_c mask[m,c] * x[c]      (sublane reduce)
        #   adj[c] = sum_m mask[m,c] * y[m]
        # All ops are lane-independent -> overhanging tail lanes stay garbage
        # in their own lanes and are dropped by the masked store.
        adj = None
        for mm in range(num_meas):                           # M is small -> unroll
            mask_m = mask_ref[mm].astype(jnp.float32)        # (C, T)
            y_m = jnp.sum(mask_m * x_b, axis=0, keepdims=True)   # (1, T)
            term = mask_m * y_m                              # (C, T)
            adj = term if adj is None else adj + term        # (C, T) accumulator

        # --- model2: 1x1 conv -> ReLU -> 1x1 conv (channel-mixing matmuls) ---
        h = jnp.dot(w1, adj.astype(w1.dtype),
                    preferred_element_type=jnp.float32)      # (Hd, T)
        h = jnp.maximum(h + b1, 0.0)
        out = jnp.dot(w2, h.astype(w2.dtype),
                      preferred_element_type=jnp.float32)    # (C, T)
        out_ref[b] = (out + b2).astype(out_ref.dtype)


def ssl_simulation(x, mask, w1, b1, w2, b2, *, spectral_pad=True,
                   stream_dtype=jnp.bfloat16, mxu_dtype=None,
                   out_dtype=jnp.float32, hw_tile=None, vmem_limit_bytes=None):
    """x: (B, C, H, W). Returns (B, C, H, W) (padding channels already removed).

    When spectral_pad=True the weights are sized for the padded cube
    (w1: (Hd, C+2), w2: (C+2, Hd), b2: (C+2, 1)); the zero pad columns and the
    discarded output rows are folded out on the host.
    stream_dtype controls how x/mask are streamed from HBM (default bf16; pass
    stream-dtype arrays to skip the host cast entirely). mxu_dtype controls the
    matmul operand dtype (defaults to stream_dtype); accumulation stays f32.
    out_dtype may be bf16 to halve the output HBM stream.
    """
    B, C, H, W = x.shape
    M = mask.shape[0]
    HW = H * W
    Hd = w1.shape[0]

    if spectral_pad:
        # Zero pad channels contribute nothing to w1 @ adj, and padded output
        # rows are sliced away by the SSL wrapper -> fold both into the weights.
        w1 = w1[:, 1:-1]
        w2 = w2[1:-1, :]
        b2 = b2[1:-1, :]

    if stream_dtype is None:
        stream_dtype = x.dtype
    if mxu_dtype is None:
        mxu_dtype = stream_dtype
    stream_bytes = jnp.dtype(stream_dtype).itemsize
    out_bytes = jnp.dtype(out_dtype).itemsize

    budget, limit = _vmem_budgets()
    if vmem_limit_bytes is None:
        vmem_limit_bytes = limit
    if hw_tile is None:
        hw_tile = _pick_hw_tile(HW, B, M, C, Hd, stream_bytes, out_bytes, budget)
    num_t = pl.cdiv(HW, hw_tile)

    # Reshapes are metadata-only; casts are skipped when the caller already
    # supplies stream-dtype arrays (pre-convert the static mask once per model).
    x2 = x.reshape(B, C, HW)
    mask2 = mask.reshape(M, C, HW)
    if x2.dtype != stream_dtype:
        x2 = x2.astype(stream_dtype)
    if mask2.dtype != stream_dtype:
        mask2 = mask2.astype(stream_dtype)
    w1 = w1.astype(mxu_dtype)
    w2 = w2.astype(mxu_dtype)
    b1 = b1.astype(jnp.float32)
    b2 = b2.astype(jnp.float32)

    kernel = functools.partial(_ssl_kernel, num_meas=M, batch=B)

    out = pl.pallas_call(
        kernel,
        out_shape=jax.ShapeDtypeStruct((B, C, HW), out_dtype),
        grid_spec=pltpu.PrefetchScalarGridSpec(
            num_scalar_prefetch=0,
            # Single spatial-tile axis: whole batch per step, one mask DMA per
            # spatial tile, and any dual-TC split lands on the HW axis.
            grid=(num_t,),
            in_specs=[
                pl.BlockSpec((B, C, hw_tile), lambda t: (0, 0, t)),   # x
                pl.BlockSpec((M, C, hw_tile), lambda t: (0, 0, t)),   # mask
                pl.BlockSpec((Hd, C), lambda t: (0, 0)),              # w1
                pl.BlockSpec((Hd, 1), lambda t: (0, 0)),              # b1
                pl.BlockSpec((C, Hd), lambda t: (0, 0)),              # w2
                pl.BlockSpec((C, 1), lambda t: (0, 0)),               # b2
            ],
            out_specs=pl.BlockSpec((B, C, hw_tile), lambda t: (0, 0, t)),
        ),
        compiler_params=pltpu.CompilerParams(
            dimension_semantics=("parallel",),
            vmem_limit_bytes=vmem_limit_bytes),
    )(x2, mask2, w1, b1, w2, b2)

    # TODO(synk): for very small C (<8) a sublane-packed (M*C, T) mask layout
    # would improve VPU utilization; irrelevant once production C is >= 8.
    return out.reshape(B, C, H, W)


def _reference(x, mask, w1, b1, w2, b2, spectral_pad=True):
    """Plain-JAX reference of the same forward pass (f32)."""
    y = jnp.einsum("mchw,bchw->bmhw", mask, x)
    adj = jnp.einsum("mchw,bmhw->bchw", mask, y)
    if spectral_pad:
        adj = jnp.pad(adj, ((0, 0), (1, 1), (0, 0), (0, 0)))
    h = jnp.einsum("kc,bchw->bkhw", w1, adj) + b1[None, :, 0, None, None]
    h = jnp.maximum(h, 0.0)
    out = jnp.einsum("ck,bkhw->bchw", w2, h) + b2[None, :, 0, None, None]
    if spectral_pad:
        out = out[:, 1:-1, :, :]
    return out


if __name__ == "__main__":
    # Small shapes consistent with the module's forward pass.
    B, C, H, W = 2, 4, 16, 16        # batch, spectral channels, spatial
    M = 3                            # number of simulated measurements
    HIDDEN = 32                      # reconstruction-net hidden channels
    CP = C + 2                       # spectral_pad -> +2 channels

    key = jax.random.PRNGKey(0)
    kx, km, k1, k2, k3, k4, kx2, km2 = jax.random.split(key, 8)

    x = jax.random.uniform(kx, (B, C, H, W), dtype=jnp.float32)
    mask = jax.random.uniform(km, (M, C, H, W), dtype=jnp.float32)
    w1 = 0.1 * jax.random.normal(k1, (HIDDEN, CP), dtype=jnp.float32)
    b1 = 0.01 * jax.random.normal(k2, (HIDDEN, 1), dtype=jnp.float32)
    w2 = 0.1 * jax.random.normal(k3, (CP, HIDDEN), dtype=jnp.float32)
    b2 = 0.01 * jax.random.normal(k4, (CP, 1), dtype=jnp.float32)

    ref = _reference(x, mask, w1, b1, w2, b2, spectral_pad=True)

    # 1) Exact path: f32 streaming + f32 matmuls — matches module semantics.
    out = ssl_simulation(x, mask, w1, b1, w2, b2,
                         stream_dtype=jnp.float32, mxu_dtype=jnp.float32)
    out = jax.block_until_ready(out)
    assert out.shape == (B, C, H, W), out.shape
    assert jnp.allclose(out, ref, atol=1e-4, rtol=1e-4), "f32 mismatch vs reference"

    # 2) Default perf path: bf16 streaming + bf16 MXU weights, f32 accumulate.
    out_bf = jax.block_until_ready(ssl_simulation(x, mask, w1, b1, w2, b2))
    assert jnp.allclose(out_bf, ref, atol=5e-2, rtol=5e-2), "bf16 mismatch vs reference"

    # 3) bf16 output (halves the output HBM stream).
    out_lo = jax.block_until_ready(
        ssl_simulation(x, mask, w1, b1, w2, b2, out_dtype=jnp.bfloat16))
    assert out_lo.dtype == jnp.bfloat16
    assert jnp.allclose(out_lo.astype(jnp.float32), ref, atol=5e-2, rtol=5e-2), \
        "bf16-out mismatch vs reference"

    # 4) Spatial size not a multiple of 128 exercises the block-overhang path
    #    (no host pad, OOB tail lanes dropped on store).
    Ho = Wo = 10
    xo = jax.random.uniform(kx2, (B, C, Ho, Wo), dtype=jnp.float32)
    masko = jax.random.uniform(km2, (M, C, Ho, Wo), dtype=jnp.float32)
    ref_o = _reference(xo, masko, w1, b1, w2, b2, spectral_pad=True)
    out_o = jax.block_until_ready(
        ssl_simulation(xo, masko, w1, b1, w2, b2,
                       stream_dtype=jnp.float32, mxu_dtype=jnp.float32))
    assert out_o.shape == (B, C, Ho, Wo), out_o.shape
    assert jnp.allclose(out_o, ref_o, atol=1e-4, rtol=1e-4), "odd-size mismatch vs reference"

    print("KERNEL_OK")
</pallas_src>

<mosaic_0001>
module attributes {stable_mosaic.version = 11 : i64} {
  func.func @_ssl_kernel(%arg0: i32, %arg1: memref<2x4x256xf32, #tpu.memory_space<vmem>>, %arg2: memref<3x4x256xf32, #tpu.memory_space<vmem>>, %arg3: memref<32x4xf32, #tpu.memory_space<vmem>>, %arg4: memref<32x1xf32, #tpu.memory_space<vmem>>, %arg5: memref<4x32xf32, #tpu.memory_space<vmem>>, %arg6: memref<4x1xf32, #tpu.memory_space<vmem>>, %arg7: memref<2x4x256xf32, #tpu.memory_space<vmem>>) attributes {dimension_semantics = [#tpu.dimension_semantics<parallel>], iteration_bounds = array<i64: 1>, scalar_prefetch = 0 : i64, scratch_operands = 0 : i64, tpu.core_type = #tpu.core_type<tc>, window_params = [{transform_indices = @transform_0, window_bounds = array<i64: 2, 4, 256>}, {transform_indices = @transform_1, window_bounds = array<i64: 3, 4, 256>}, {pipeline_mode = #tpu.pipeline_mode<synchronous>, transform_indices = @transform_2, window_bounds = array<i64: 32, 4>}, {pipeline_mode = #tpu.pipeline_mode<synchronous>, transform_indices = @transform_3, window_bounds = array<i64: 32, 1>}, {pipeline_mode = #tpu.pipeline_mode<synchronous>, transform_indices = @transform_4, window_bounds = array<i64: 4, 32>}, {pipeline_mode = #tpu.pipeline_mode<synchronous>, transform_indices = @transform_5, window_bounds = array<i64: 4, 1>}, {transform_indices = @transform_6, window_bounds = array<i64: 2, 4, 256>}]} {
    %c0 = arith.constant 0 : index
    %c0_0 = arith.constant 0 : index
    %0 = vector.load %arg3[%c0, %c0_0] : memref<32x4xf32, #tpu.memory_space<vmem>>, vector<32x4xf32>
    %c0_1 = arith.constant 0 : index
    %c0_2 = arith.constant 0 : index
    %1 = vector.load %arg5[%c0_1, %c0_2] : memref<4x32xf32, #tpu.memory_space<vmem>>, vector<4x32xf32>
    %c0_3 = arith.constant 0 : index
    %c0_4 = arith.constant 0 : index
    %2 = vector.load %arg4[%c0_3, %c0_4] : memref<32x1xf32, #tpu.memory_space<vmem>>, vector<32x1xf32>
    %c0_5 = arith.constant 0 : index
    %c0_6 = arith.constant 0 : index
    %3 = vector.load %arg6[%c0_5, %c0_6] : memref<4x1xf32, #tpu.memory_space<vmem>>, vector<4x1xf32>
    %c0_7 = arith.constant 0 : index
    %c0_8 = arith.constant 0 : index
    %c0_9 = arith.constant 0 : index
    %4 = vector.load %arg1[%c0_7, %c0_8, %c0_9] : memref<2x4x256xf32, #tpu.memory_space<vmem>>, vector<1x4x256xf32>
    %5 = vector.shape_cast %4 : vector<1x4x256xf32> to vector<4x256xf32>
    %c0_10 = arith.constant 0 : index
    %c0_11 = arith.constant 0 : index
    %c0_12 = arith.constant 0 : index
    %6 = vector.load %arg2[%c0_10, %c0_11, %c0_12] : memref<3x4x256xf32, #tpu.memory_space<vmem>>, vector<1x4x256xf32>
    %7 = vector.shape_cast %6 : vector<1x4x256xf32> to vector<4x256xf32>
    %8 = arith.mulf %7, %5 : vector<4x256xf32>
    %cst = arith.constant dense<0.000000e+00> : vector<256xf32>
    %9 = vector.multi_reduction <add>, %8, %cst [0] : vector<4x256xf32> to vector<256xf32>
    %10 = vector.shape_cast %9 : vector<256xf32> to vector<1x256xf32>
    %11 = vector.broadcast %10 : vector<1x256xf32> to vector<4x256xf32>
    %12 = arith.mulf %7, %11 : vector<4x256xf32>
    %c1 = arith.constant 1 : index
    %c0_13 = arith.constant 0 : index
    %c0_14 = arith.constant 0 : index
    %13 = vector.load %arg2[%c1, %c0_13, %c0_14] : memref<3x4x256xf32, #tpu.memory_space<vmem>>, vector<1x4x256xf32>
    %14 = vector.shape_cast %13 : vector<1x4x256xf32> to vector<4x256xf32>
    %15 = arith.mulf %14, %5 : vector<4x256xf32>
    %cst_15 = arith.constant dense<0.000000e+00> : vector<256xf32>
    %16 = vector.multi_reduction <add>, %15, %cst_15 [0] : vector<4x256xf32> to vector<256xf32>
    %17 = vector.shape_cast %16 : vector<256xf32> to vector<1x256xf32>
    %18 = vector.broadcast %17 : vector<1x256xf32> to vector<4x256xf32>
    %19 = arith.mulf %14, %18 : vector<4x256xf32>
    %20 = arith.addf %12, %19 : vector<4x256xf32>
    %c2 = arith.constant 2 : index
    %c0_16 = arith.constant 0 : index
    %c0_17 = arith.constant 0 : index
    %21 = vector.load %arg2[%c2, %c0_16, %c0_17] : memref<3x4x256xf32, #tpu.memory_space<vmem>>, vector<1x4x256xf32>
    %22 = vector.shape_cast %21 : vector<1x4x256xf32> to vector<4x256xf32>
    %23 = arith.mulf %22, %5 : vector<4x256xf32>
    %cst_18 = arith.constant dense<0.000000e+00> : vector<256xf32>
    %24 = vector.multi_reduction <add>, %23, %cst_18 [0] : vector<4x256xf32> to vector<256xf32>
    %25 = vector.shape_cast %24 : vector<256xf32> to vector<1x256xf32>
    %26 = vector.broadcast %25 : vector<1x256xf32> to vector<4x256xf32>
    %27 = arith.mulf %22, %26 : vector<4x256xf32>
    %28 = arith.addf %20, %27 : vector<4x256xf32>
    %cst_19 = arith.constant dense<0.000000e+00> : vector<32x256xf32>
    %29 = tpu.matmul %0, %28, %cst_19 {dimension_numbers = #tpu.dot_dimension_numbers<[1], [0], [0], [1], [0, 0, 1, 1], [], []>} : vector<32x4xf32>, vector<4x256xf32>, vector<32x256xf32> -> vector<32x256xf32>
    %30 = vector.broadcast %2 : vector<32x1xf32> to vector<32x256xf32>
    %31 = arith.addf %29, %30 : vector<32x256xf32>
    %cst_20 = arith.constant 0.000000e+00 : f32
    %32 = vector.broadcast %cst_20 : f32 to vector<32x256xf32>
    %33 = arith.maximumf %31, %32 : vector<32x256xf32>
    %cst_21 = arith.constant dense<0.000000e+00> : vector<4x256xf32>
    %34 = tpu.matmul %1, %33, %cst_21 {dimension_numbers = #tpu.dot_dimension_numbers<[1], [0], [0], [1], [0, 0, 1, 1], [], []>} : vector<4x32xf32>, vector<32x256xf32>, vector<4x256xf32> -> vector<4x256xf32>
    %35 = vector.broadcast %3 : vector<4x1xf32> to vector<4x256xf32>
    %36 = arith.addf %34, %35 : vector<4x256xf32>
    %c0_22 = arith.constant 0 : index
    %c0_23 = arith.constant 0 : index
    %c0_24 = arith.constant 0 : index
    %37 = vector.load %arg7[%c0_22, %c0_23, %c0_24] : memref<2x4x256xf32, #tpu.memory_space<vmem>>, vector<1x4x256xf32>
    %38 = vector.shape_cast %37 : vector<1x4x256xf32> to vector<4x256xf32>
    %39 = vector.shape_cast %36 : vector<4x256xf32> to vector<1x4x256xf32>
    tpu.vector_store %arg7[%c0_22, %c0_23, %c0_24], %39 {strides = array<i32>} : memref<2x4x256xf32, #tpu.memory_space<vmem>>, vector<1x4x256xf32>,
    %c1_25 = arith.constant 1 : index
    %c0_26 = arith.constant 0 : index
    %c0_27 = arith.constant 0 : index
    %40 = vector.load %arg1[%c1_25, %c0_26, %c0_27] : memref<2x4x256xf32, #tpu.memory_space<vmem>>, vector<1x4x256xf32>
    %41 = vector.shape_cast %40 : vector<1x4x256xf32> to vector<4x256xf32>
    %c0_28 = arith.constant 0 : index
    %c0_29 = arith.constant 0 : index
    %c0_30 = arith.constant 0 : index
    %42 = vector.load %arg2[%c0_28, %c0_29, %c0_30] : memref<3x4x256xf32, #tpu.memory_space<vmem>>, vector<1x4x256xf32>
    %43 = vector.shape_cast %42 : vector<1x4x256xf32> to vector<4x256xf32>
    %44 = arith.mulf %43, %41 : vector<4x256xf32>
    %cst_31 = arith.constant dense<0.000000e+00> : vector<256xf32>
    %45 = vector.multi_reduction <add>, %44, %cst_31 [0] : vector<4x256xf32> to vector<256xf32>
    %46 = vector.shape_cast %45 : vector<256xf32> to vector<1x256xf32>
    %47 = vector.broadcast %46 : vector<1x256xf32> to vector<4x256xf32>
    %48 = arith.mulf %43, %47 : vector<4x256xf32>
    %c1_32 = arith.constant 1 : index
    %c0_33 = arith.constant 0 : index
    %c0_34 = arith.constant 0 : index
    %49 = vector.load %arg2[%c1_32, %c0_33, %c0_34] : memref<3x4x256xf32, #tpu.memory_space<vmem>>, vector<1x4x256xf32>
    %50 = vector.shape_cast %49 : vector<1x4x256xf32> to vector<4x256xf32>
    %51 = arith.mulf %50, %41 : vector<4x256xf32>
    %cst_35 = arith.constant dense<0.000000e+00> : vector<256xf32>
    %52 = vector.multi_reduction <add>, %51, %cst_35 [0] : vector<4x256xf32> to vector<256xf32>
    %53 = vector.shape_cast %52 : vector<256xf32> to vector<1x256xf32>
    %54 = vector.broadcast %53 : vector<1x256xf32> to vector<4x256xf32>
    %55 = arith.mulf %50, %54 : vector<4x256xf32>
    %56 = arith.addf %48, %55 : vector<4x256xf32>
    %c2_36 = arith.constant 2 : index
    %c0_37 = arith.constant 0 : index
    %c0_38 = arith.constant 0 : index
    %57 = vector.load %arg2[%c2_36, %c0_37, %c0_38] : memref<3x4x256xf32, #tpu.memory_space<vmem>>, vector<1x4x256xf32>
    %58 = vector.shape_cast %57 : vector<1x4x256xf32> to vector<4x256xf32>
    %59 = arith.mulf %58, %41 : vector<4x256xf32>
    %cst_39 = arith.constant dense<0.000000e+00> : vector<256xf32>
    %60 = vector.multi_reduction <add>, %59, %cst_39 [0] : vector<4x256xf32> to vector<256xf32>
    %61 = vector.shape_cast %60 : vector<256xf32> to vector<1x256xf32>
    %62 = vector.broadcast %61 : vector<1x256xf32> to vector<4x256xf32>
    %63 = arith.mulf %58, %62 : vector<4x256xf32>
    %64 = arith.addf %56, %63 : vector<4x256xf32>
    %cst_40 = arith.constant dense<0.000000e+00> : vector<32x256xf32>
    %65 = tpu.matmul %0, %64, %cst_40 {dimension_numbers = #tpu.dot_dimension_numbers<[1], [0], [0], [1], [0, 0, 1, 1], [], []>} : vector<32x4xf32>, vector<4x256xf32>, vector<32x256xf32> -> vector<32x256xf32>
    %66 = vector.broadcast %2 : vector<32x1xf32> to vector<32x256xf32>
    %67 = arith.addf %65, %66 : vector<32x256xf32>
    %cst_41 = arith.constant 0.000000e+00 : f32
    %68 = vector.broadcast %cst_41 : f32 to vector<32x256xf32>
    %69 = arith.maximumf %67, %68 : vector<32x256xf32>
    %cst_42 = arith.constant dense<0.000000e+00> : vector<4x256xf32>
    %70 = tpu.matmul %1, %69, %cst_42 {dimension_numbers = #tpu.dot_dimension_numbers<[1], [0], [0], [1], [0, 0, 1, 1], [], []>} : vector<4x32xf32>, vector<32x256xf32>, vector<4x256xf32> -> vector<4x256xf32>
    %71 = vector.broadcast %3 : vector<4x1xf32> to vector<4x256xf32>
    %72 = arith.addf %70, %71 : vector<4x256xf32>
    %c1_43 = arith.constant 1 : index
    %c0_44 = arith.constant 0 : index
    %c0_45 = arith.constant 0 : index
    %73 = vector.load %arg7[%c1_43, %c0_44, %c0_45] : memref<2x4x256xf32, #tpu.memory_space<vmem>>, vector<1x4x256xf32>
    %74 = vector.shape_cast %73 : vector<1x4x256xf32> to vector<4x256xf32>
    %75 = vector.shape_cast %72 : vector<4x256xf32> to vector<1x4x256xf32>
    tpu.vector_store %arg7[%c1_43, %c0_44, %c0_45], %75 {strides = array<i32>} : memref<2x4x256xf32, #tpu.memory_space<vmem>>, vector<1x4x256xf32>,
    return
  }
  func.func @transform_0(%arg0: i32) -> (i32, i32, i32) {
    %c0_i32 = arith.constant 0 : i32
    %c0_i32_0 = arith.constant 0 : i32
    %c0_i32_1 = arith.constant 0 : i32
    return %c0_i32, %c0_i32_0, %arg0 : i32, i32, i32
  }
  func.func @transform_1(%arg0: i32) -> (i32, i32, i32) {
    %c0_i32 = arith.constant 0 : i32
    %c0_i32_0 = arith.constant 0 : i32
    %c0_i32_1 = arith.constant 0 : i32
    return %c0_i32, %c0_i32_0, %arg0 : i32, i32, i32
  }
  func.func @transform_2(%arg0: i32) -> (i32, i32) {
    %c0_i32 = arith.constant 0 : i32
    %c0_i32_0 = arith.constant 0 : i32
    %c0_i32_1 = arith.constant 0 : i32
    return %c0_i32, %c0_i32_0 : i32, i32
  }
  func.func @transform_3(%arg0: i32) -> (i32, i32) {
    %c0_i32 = arith.constant 0 : i32
    %c0_i32_0 = arith.constant 0 : i32
    %c0_i32_1 = arith.constant 0 : i32
    return %c0_i32, %c0_i32_0 : i32, i32
  }
  func.func @transform_4(%arg0: i32) -> (i32, i32) {
    %c0_i32 = arith.constant 0 : i32
    %c0_i32_0 = arith.constant 0 : i32
    %c0_i32_1 = arith.constant 0 : i32
    return %c0_i32, %c0_i32_0 : i32, i32
  }
  func.func @transform_5(%arg0: i32) -> (i32, i32) {
    %c0_i32 = arith.constant 0 : i32
    %c0_i32_0 = arith.constant 0 : i32
    %c0_i32_1 = arith.constant 0 : i32
    return %c0_i32, %c0_i32_0 : i32, i32
  }
  func.func @transform_6(%arg0: i32) -> (i32, i32, i32) {
    %c0_i32 = arith.constant 0 : i32
    %c0_i32_0 = arith.constant 0 : i32
    %c0_i32_1 = arith.constant 0 : i32
    return %c0_i32, %c0_i32_0, %arg0 : i32, i32, i32
  }
}

</mosaic_0001>

<bundles_post_ra>
// kernel: tpu_custom_call.1
= control target key start
LH: loop header
LB: loop body
LE: loop exit
PB: predicated region body
PF: predicated region fallthrough
CT: control target
= control target key end

     0   :  { %s772_s0 = inlined_call_operand.vmem [shape: f32[2,4,256], index: 0, kind: input, shape index: {}]   ;;  %s773_s1 = inlined_call_operand.vmem [shape: f32[3,4,256], index: 1, kind: input, shape index: {}]   ;;  %s774_s2 = inlined_call_operand.vmem [shape: f32[32,4], index: 2, kind: input, shape index: {}]   ;;  %s775_s3 = inlined_call_operand.vmem [shape: f32[32,1], index: 3, kind: input, shape index: {}]   ;;  %s776_s4 = inlined_call_operand.vmem [shape: f32[4,32], index: 4, kind: input, shape index: {}]   ;;  %s777_s5 = inlined_call_operand.vmem [shape: f32[4,1], index: 5, kind: input, shape index: {}]   ;;  %s778_s6 = inlined_call_operand.hbm [shape: f32[2,4,256], index: 6, kind: output, shape index: {}]  }
   0x1   :  { %v34_v0 = vld [vmem:[%s772_s0] sm:$0xff] }
   0x2   :  { %v620_v1 = vld [vmem:[%s773_s1] sm:$0xff] }
   0x3   :  { %v36_v2 = vmul.f32 %v620_v1, %v34_v0 }
   0x4   :  { %11 = vsyncpa [#allocation3], 0  ;;  %v626_v3 = vld [vmem:[%s773_s1 + $0x8] sm:$0xff]  ;;  %vm43_vm0 = vcmask 1043456   ;;  %v634_v11 = vld [vmem:[%s773_s1 + $0x10] sm:$0xff]  ;;  %v575_v36 = vmov 0  }
   0x5   :  { %38 = vst [vmem:[#allocation1] ss:$2 sm:$0xff] %v36_v2  ;;  %v66_v4 = vmul.f32 %v626_v3, %v34_v0  ;;  %v96_v14 = vmul.f32 %v634_v11, %v34_v0  ;;  %547 = vset.pattern.permute.xlu1 %v575_v36  ;;  %546 = vset.pattern.permute.xlu0 %v575_v36  ;;  %v30_v39 = vld [vmem:[%s775_s3 + $0x8] sm:$0xff]  ;;  %v29_v57 = vld [vmem:[%s775_s3] sm:$0xff]  ;;  %vm148_vm1 = vcmask 31744   ;;  %vm236_vm2 = vcmask 261120  }
   0x6   :  { %548 = vset.pattern.permute.xlu2 %v575_v36  ;;  %131 = vperm.xlu1 %547, %v30_v39   ;;  %s501_s25 = sshll.u32 %s778_s6, 4  ;;  %s577_s26 = smov 128   ;;  %s502_s25 = int_to_ptr.hbm [resolvable:$true] %s501_s25 }
   0x7   :  { %s578_s27 = smov 8  }
   0xc   :  { %v39_v5 = vld.sshfl [vmem:[#allocation1] sm:$0xff pattern:$0x75316420]  ;;  %v40_v6 = vld.sshfl [vmem:[#allocation1 + $0x8] sm:$0xff pattern:$0x75316420] }
   0xd   :  { %v44_v7 = vsel %vm43_vm0, %v39_v5, 0.0  ;;  %v51_v8 = vsel %vm43_vm0, %v40_v6, 0.0  ;;  %68 = vst [vmem:[#allocation1] ss:$2 sm:$0xff] %v66_v4  ;;  %v32_v5 = vld [vmem:[%s775_s3 + $0x18] sm:$0xff] }
   0xe   :  { %v45_v9 = vrot.slane %v44_v7, 4  ;;  %v52_v10 = vrot.slane %v51_v8, 4  ;;  %126 = vperm.xlu1 %547, %v29_v57   ;;  %141 = vperm.xlu0 %546, %v32_v5  }
  0x10   :  { %v46_v12 = vadd.f32 %v45_v9, %v44_v7  ;;  %v53_v13 = vadd.f32 %v52_v10, %v51_v8  ;;  %v527_v8 = vld [vmem:[%s772_s0 + $0x8] sm:$0xff]  ;;  %v31_v9 = vld [vmem:[%s775_s3 + $0x10] sm:$0xff] }
  0x11   :  { %v289_v10 = vmul.f32 %v527_v8, %v620_v1 }
  0x12   :  { %v54_v15 = vrot.slane %v53_v13, 2  ;;  %v47_v16 = vrot.slane %v46_v12, 2 }
  0x14   :  { %v55_v17 = vadd.f32 %v54_v15, %v53_v13  ;;  %v69_v18 = vld.sshfl [vmem:[#allocation1] sm:$0xff pattern:$0x75316420]  ;;  %v70_v19 = vld.sshfl [vmem:[#allocation1 + $0x8] sm:$0xff pattern:$0x75316420]  ;;  %v48_v24 = vadd.f32 %v47_v16, %v46_v12  ;;  %v317_v15 = vmul.f32 %v527_v8, %v626_v3 }
  0x15   :  { %v73_v20 = vsel %vm43_vm0, %v69_v18, 0.0  ;;  %v80_v21 = vsel %vm43_vm0, %v70_v19, 0.0  ;;  %98 = vst [vmem:[#allocation1] ss:$2 sm:$0xff] %v96_v14  ;;  %v666_v12 = vld [vmem:[%s774_s2] sm:$0xff]  ;;  %v678_v16 = vld [vmem:[%s774_s2 + $0x8] sm:$0xff] }
  0x16   :  { %v74_v22 = vrot.slane %v73_v20, 4  ;;  %v81_v23 = vrot.slane %v80_v21, 4  ;;  %v56_v25 = vrot.slane %v55_v17, 1  ;;  %v49_v30 = vrot.slane %v48_v24, 1  ;;  %136 = vperm.xlu0 %546, %v31_v9  }
  0x18   :  { %v75_v26 = vadd.f32 %v74_v22, %v73_v20  ;;  %v82_v27 = vadd.f32 %v81_v23, %v80_v21  ;;  %v57_v31 = vadd.f32 %v56_v25, %v55_v17  ;;  %v50_v44 = vadd.f32 %v49_v30, %v48_v24 }
  0x19   :  { %v346_v25 = vmul.f32 %v527_v8, %v634_v11 }
  0x1a   :  { %v76_v28 = vrot.slane %v75_v26, 2  ;;  %v83_v29 = vrot.slane %v82_v27, 2  ;;  %v60_v45 = vrot.slane %v57_v31, 4 }
  0x1c   :  { %v77_v32 = vadd.f32 %v76_v28, %v75_v26  ;;  %v84_v33 = vadd.f32 %v83_v29, %v82_v27  ;;  %v99_v34 = vld.sshfl [vmem:[#allocation1] sm:$0xff pattern:$0x75316420]  ;;  %v100_v35 = vld.sshfl [vmem:[#allocation1 + $0x8] sm:$0xff pattern:$0x75316420]  ;;  %v61_v53 = vsel %vm43_vm0, %v50_v44, %v60_v45 }
  0x1d   :  { %v103_v37 = vsel %vm43_vm0, %v99_v34, 0.0  ;;  %v110_v38 = vsel %vm43_vm0, %v100_v35, 0.0  ;;  %v63_v60 = vmul.f32 %v61_v53, %v620_v1  ;;  %v690_v28 = vld [vmem:[%s774_s2 + $0x10] sm:$0xff]  ;;  %v701_v44 = vld [vmem:[%s774_s2 + $0x18] sm:$0xff] }
  0x1e   :  { %v78_v40 = vrot.slane %v77_v32, 1  ;;  %v85_v41 = vrot.slane %v84_v33, 1  ;;  %v104_v42 = vrot.slane %v103_v37, 4  ;;  %v111_v43 = vrot.slane %v110_v38, 4 }
  0x20   :  { %v79_v46 = vadd.f32 %v78_v40, %v77_v32  ;;  %v86_v47 = vadd.f32 %v85_v41, %v84_v33  ;;  %v105_v48 = vadd.f32 %v104_v42, %v103_v37  ;;  %v112_v49 = vadd.f32 %v111_v43, %v110_v38 }
  0x22   :  { %v89_v50 = vrot.slane %v86_v47, 4  ;;  %v106_v51 = vrot.slane %v105_v48, 2  ;;  %v113_v52 = vrot.slane %v112_v49, 2 }
  0x24   :  { %v90_v54 = vsel %vm43_vm0, %v79_v46, %v89_v50  ;;  %v107_v55 = vadd.f32 %v106_v51, %v105_v48  ;;  %v114_v56 = vadd.f32 %v113_v52, %v112_v49 }
  0x25   :  { %v92_v61 = vmul.f32 %v626_v3, %v90_v54 }
  0x26   :  { %v108_v58 = vrot.slane %v107_v55, 1  ;;  %v115_v59 = vrot.slane %v114_v56, 1 }
  0x27   :  { %v93_v2 = vadd.f32 %v92_v61, %v63_v60 }
  0x28   :  { %v109_v62 = vadd.f32 %v108_v58, %v107_v55  ;;  %v116_v63 = vadd.f32 %v115_v59, %v114_v56 }
  0x2a   :  { %v119_v0 = vrot.slane %v116_v63, 4 }
  0x2c   :  { %v120_v4 = vsel %vm43_vm0, %v109_v62, %v119_v0 }
  0x2d   :  { %v122_v6 = vmul.f32 %v634_v11, %v120_v4 }
  0x2f   :  { %v123_v7 = vadd.f32 %v122_v6, %v93_v2 }
  0x31   :  { %145 = vst [vmem:[#allocation1] ss:$2 sm:$0xff] %v123_v7 }
  0x38   :  { %v146_v13 = vld.sshfl [vmem:[#allocation1] sm:$0xff pattern:$0x75316420]  ;;  %v147_v14 = vld.sshfl [vmem:[#allocation1 + $0x8] sm:$0xff pattern:$0x75316420] }
  0x39   :  { %515 = vmatpush.msk.msra.mxu0 %vm43_vm0, %v146_v13  ;;  %520 = vmatpush.msk.msra.mxu1 %vm43_vm0, %v147_v14  ;;  %291 = vst [vmem:[#allocation1] ss:$2 sm:$0xff] %v289_v10 }
  0x3a   :  { %516 = vmatmul.msk.f32.vlgmr.msra.gmra.mxu0 %vm148_vm1, %v666_v12  ;;  %521 = vmatmul.msk.f32.vlgmr.msra.gmra.mxu1 %vm148_vm1, %v666_v12 }
  0x40   :  { %v292_v17 = vld.sshfl [vmem:[#allocation1] sm:$0xff pattern:$0x75316420]  ;;  %v293_v18 = vld.sshfl [vmem:[#allocation1 + $0x8] sm:$0xff pattern:$0x75316420] }
  0x41   :  { %v296_v19 = vsel %vm43_vm0, %v292_v17, 0.0  ;;  %v303_v20 = vsel %vm43_vm0, %v293_v18, 0.0  ;;  %319 = vst [vmem:[#allocation1] ss:$2 sm:$0xff] %v317_v15 }
  0x42   :  { %v297_v21 = vrot.slane %v296_v19, 4  ;;  %v304_v22 = vrot.slane %v303_v20, 4  ;;  %517 = vmatmul.msk.f32.gmra.mxu0 %vm148_vm1, %v678_v16  ;;  %522 = vmatmul.msk.f32.gmra.mxu1 %vm148_vm1, %v678_v16 }
  0x44   :  { %v298_v23 = vadd.f32 %v297_v21, %v296_v19  ;;  %v305_v24 = vadd.f32 %v304_v22, %v303_v20 }
  0x46   :  { %v306_v26 = vrot.slane %v305_v24, 2  ;;  %v299_v27 = vrot.slane %v298_v23, 2 }
  0x48   :  { %v307_v29 = vadd.f32 %v306_v26, %v305_v24  ;;  %v320_v30 = vld.sshfl [vmem:[#allocation1] sm:$0xff pattern:$0x75316420]  ;;  %v321_v31 = vld.sshfl [vmem:[#allocation1 + $0x8] sm:$0xff pattern:$0x75316420]  ;;  %v300_v36 = vadd.f32 %v299_v27, %v298_v23 }
  0x49   :  { %v324_v32 = vsel %vm43_vm0, %v320_v30, 0.0  ;;  %v331_v33 = vsel %vm43_vm0, %v321_v31, 0.0  ;;  %348 = vst [vmem:[#allocation1] ss:$2 sm:$0xff] %v346_v25 }
  0x4a   :  { %v325_v34 = vrot.slane %v324_v32, 4  ;;  %v332_v35 = vrot.slane %v331_v33, 4  ;;  %518 = vmatmul.msk.f32.gmra.mxu0 %vm148_vm1, %v690_v28  ;;  %523 = vmatmul.msk.f32.gmra.mxu1 %vm148_vm1, %v690_v28  ;;  %v308_v37 = vrot.slane %v307_v29, 1  ;;  %v301_v42 = vrot.slane %v300_v36, 1 }
  0x4c   :  { %v326_v38 = vadd.f32 %v325_v34, %v324_v32  ;;  %v333_v39 = vadd.f32 %v332_v35, %v331_v33  ;;  %v309_v43 = vadd.f32 %v308_v37, %v307_v29  ;;  %v302_v55 = vadd.f32 %v301_v42, %v300_v36 }
  0x4e   :  { %v327_v40 = vrot.slane %v326_v38, 2  ;;  %v334_v41 = vrot.slane %v333_v39, 2  ;;  %v312_v56 = vrot.slane %v309_v43, 4 }
  0x50   :  { %v328_v45 = vadd.f32 %v327_v40, %v326_v38  ;;  %v335_v46 = vadd.f32 %v334_v41, %v333_v39  ;;  %v349_v47 = vld.sshfl [vmem:[#allocation1] sm:$0xff pattern:$0x75316420]  ;;  %v350_v48 = vld.sshfl [vmem:[#allocation1 + $0x8] sm:$0xff pattern:$0x75316420]  ;;  %v313_v0 = vsel %vm43_vm0, %v302_v55, %v312_v56 }
  0x51   :  { %v353_v49 = vsel %vm43_vm0, %v349_v47, 0.0  ;;  %v360_v50 = vsel %vm43_vm0, %v350_v48, 0.0  ;;  %v315_v8 = vmul.f32 %v313_v0, %v620_v1  ;;  %v28_v47 = vld [vmem:[%s776_s4] sm:$0xf]  ;;  %s576_s4 = smov [#allocation2]  }
  0x52   :  { %v329_v51 = vrot.slane %v328_v45, 1  ;;  %v336_v52 = vrot.slane %v335_v46, 1  ;;  %v354_v53 = vrot.slane %v353_v49, 4  ;;  %v361_v54 = vrot.slane %v360_v50, 4  ;;  %519 = vmatmul.msk.f32.gmra.mxu0 %vm148_vm1, %v701_v44  ;;  %524 = vmatmul.msk.f32.gmra.mxu1 %vm148_vm1, %v701_v44 }
  0x54   :  { %v330_v57 = vadd.f32 %v329_v51, %v328_v45  ;;  %v337_v58 = vadd.f32 %v336_v52, %v335_v46  ;;  %v355_v59 = vadd.f32 %v354_v53, %v353_v49  ;;  %v362_v60 = vadd.f32 %v361_v54, %v360_v50  ;;  %v33_v50 = vld [vmem:[%s777_s5] sm:$0xf]  ;;  %s499_s5 = sshll.u32 %s576_s4, 4  ;;  %s500_s5 = int_to_ptr.vmem [resolvable:$true] %s499_s5 }
  0x55   :  { %233 = vperm.xlu2 %548, %v33_v50  }
  0x56   :  { %v340_v61 = vrot.slane %v337_v58, 4  ;;  %v356_v62 = vrot.slane %v355_v59, 2  ;;  %v363_v63 = vrot.slane %v362_v60, 2 }
  0x58   :  { %v341_v2 = vsel %vm43_vm0, %v330_v57, %v340_v61  ;;  %v357_v4 = vadd.f32 %v356_v62, %v355_v59  ;;  %v364_v5 = vadd.f32 %v363_v63, %v362_v60 }
  0x59   :  { %v343_v9 = vmul.f32 %v626_v3, %v341_v2 }
  0x5a   :  { %v358_v6 = vrot.slane %v357_v4, 1  ;;  %v365_v7 = vrot.slane %v364_v5, 1 }
  0x5b   :  { %v344_v15 = vadd.f32 %v343_v9, %v315_v8 }
  0x5c   :  { %v359_v10 = vadd.f32 %v358_v6, %v357_v4  ;;  %v366_v13 = vadd.f32 %v365_v7, %v364_v5 }
  0x5e   :  { %v369_v14 = vrot.slane %v366_v13, 4 }
  0x60   :  { %v370_v17 = vsel %vm43_vm0, %v359_v10, %v369_v14 }
  0x61   :  { %v372_v18 = vmul.f32 %v634_v11, %v370_v17 }
  0x63   :  { %v373_v19 = vadd.f32 %v372_v18, %v344_v15 }
  0x65   :  { %375 = vst [vmem:[#allocation1] ss:$2 sm:$0xff] %v373_v19 }
  0x6c   :  { %v376_v48 = vld.sshfl [vmem:[#allocation1] sm:$0xff pattern:$0x75316420]  ;;  %v377_v49 = vld.sshfl [vmem:[#allocation1 + $0x8] sm:$0xff pattern:$0x75316420] }
  0x78   :  { %v717_v25 = vpop.permute.xlu1 %131 }
  0x80   :  { %v715_v24 = vpop.permute.xlu0 %141  ;;  %v725_v33 = vpop.permute.xlu1 %126 }
  0x88   :  { %v719_v26 = vpop.permute.xlu0 %136 }
  0xaf   :  { %v234_v51 = vpop.permute.xlu2 %233 }
  0xb7   :  { %v182_v20 = vpop.f32.mrf.mxu0  ;;  %v211_v21 = vpop.f32.mrf.mxu1 }
  0xb8   :  { %v183_v38 = vadd.f32 %v182_v20, %v725_v33  ;;  %v212_v39 = vadd.f32 %v211_v21, %v725_v33 }
  0xba   :  { %v223_v45 = vmax.f32 %v183_v38, 0.0  ;;  %v224_v46 = vmax.f32 %v212_v39, 0.0 }
  0xbf   :  { %v185_v22 = vpop.f32.mrf.mxu0  ;;  %v214_v23 = vpop.f32.mrf.mxu1 }
  0xc0   :  { %v186_v34 = vadd.f32 %v185_v22, %v717_v25  ;;  %v215_v35 = vadd.f32 %v214_v23, %v717_v25 }
  0xc2   :  { %v225_v42 = vmax.f32 %v186_v34, 0.0  ;;  %v226_v43 = vmax.f32 %v215_v35, 0.0 }
  0xc7   :  { %v188_v1 = vpop.f32.mrf.mxu0  ;;  %v217_v3 = vpop.f32.mrf.mxu1 }
  0xc8   :  { %v189_v30 = vadd.f32 %v188_v1, %v719_v26  ;;  %v218_v11 = vadd.f32 %v217_v3, %v719_v26 }
  0xca   :  { %v227_v40 = vmax.f32 %v189_v30, 0.0  ;;  %v228_v41 = vmax.f32 %v218_v11, 0.0 }
  0xcf   :  { %v191_v27 = vpop.f32.mrf.mxu0  ;;  %v220_v29 = vpop.f32.mrf.mxu1 }
  0xd0   :  { %v192_v31 = vadd.f32 %v191_v27, %v715_v24  ;;  %v221_v32 = vadd.f32 %v220_v29, %v715_v24 }
  0xd2   :  { %v229_v36 = vmax.f32 %v192_v31, 0.0  ;;  %v230_v37 = vmax.f32 %v221_v32, 0.0 }
  0xd4   :  { %252 = vmatpush.msra.mxu2 %v229_v36  ;;  %272 = vmatpush.msra.mxu3 %v230_v37 }
  0xd6   :  { %253 = vmatpush.msra.mxu2 %v227_v40  ;;  %273 = vmatpush.msra.mxu3 %v228_v41 }
  0xd8   :  { %254 = vmatpush.msra.mxu2 %v225_v42  ;;  %274 = vmatpush.msra.mxu3 %v226_v43 }
  0xda   :  { %255 = vmatpush.msra.mxu2 %v223_v45  ;;  %275 = vmatpush.msra.mxu3 %v224_v46 }
  0xdb   :  { %525 = vmatmul.msk.f32.vlgmr.msra.gmra.mxu2 %vm236_vm2, %v28_v47  ;;  %526 = vmatmul.msk.f32.vlgmr.msra.gmra.mxu3 %vm236_vm2, %v28_v47 }
  0xdc   :  { %530 = vmatpush.msk.msrb.mxu2 %vm43_vm0, %v376_v48  ;;  %535 = vmatpush.msk.msrb.mxu3 %vm43_vm0, %v377_v49 }
  0xe3   :  { %531 = vmatmul.msk.f32.vlgmr.msrb.gmra.mxu2 %vm148_vm1, %v666_v12  ;;  %536 = vmatmul.msk.f32.vlgmr.msrb.gmra.mxu3 %vm148_vm1, %v666_v12 }
  0xeb   :  { %532 = vmatmul.msk.f32.gmra.mxu2 %vm148_vm1, %v678_v16  ;;  %537 = vmatmul.msk.f32.gmra.mxu3 %vm148_vm1, %v678_v16 }
  0xf3   :  { %533 = vmatmul.msk.f32.gmra.mxu2 %vm148_vm1, %v690_v28  ;;  %538 = vmatmul.msk.f32.gmra.mxu3 %vm148_vm1, %v690_v28 }
  0xfb   :  { %534 = vmatmul.msk.f32.gmra.mxu2 %vm148_vm1, %v701_v44  ;;  %539 = vmatmul.msk.f32.gmra.mxu3 %vm148_vm1, %v701_v44 }
 0x15e   :  { %v257_v12 = vpop.f32.mrf.mxu2  ;;  %v277_v52 = vpop.f32.mrf.mxu3 }
 0x15f   :  { %v258_v53 = vadd.f32 %v257_v12, %v234_v51  ;;  %v278_v54 = vadd.f32 %v277_v52, %v234_v51 }
 0x161   :  { %v282_v55 = vrot.slane %v278_v54, 4 }
 0x163   :  { %v283_v16 = vsel %vm43_vm0, %v258_v53, %v282_v55 }
 0x164   :  { %285 = vst [vmem:[#allocation2] sm:$0xff] %v283_v16 }
 0x166   :  { %v399_v56 = vpop.f32.mrf.mxu2  ;;  %v428_v57 = vpop.f32.mrf.mxu3 }
 0x167   :  { %v400_v8 = vadd.f32 %v399_v56, %v725_v33  ;;  %v429_v9 = vadd.f32 %v428_v57, %v725_v33 }
 0x169   :  { %v440_v17 = vmax.f32 %v400_v8, 0.0  ;;  %v441_v18 = vmax.f32 %v429_v9, 0.0 }
 0x16e   :  { %v402_v58 = vpop.f32.mrf.mxu2  ;;  %v431_v59 = vpop.f32.mrf.mxu3 }
 0x16f   :  { %v403_v4 = vadd.f32 %v402_v58, %v717_v25  ;;  %v432_v5 = vadd.f32 %v431_v59, %v717_v25 }
 0x171   :  { %v442_v14 = vmax.f32 %v403_v4, 0.0  ;;  %v443_v15 = vmax.f32 %v432_v5, 0.0 }
 0x176   :  { %v405_v28 = vpop.f32.mrf.mxu2  ;;  %v434_v60 = vpop.f32.mrf.mxu3 }
 0x177   :  { %v406_v63 = vadd.f32 %v405_v28, %v719_v26  ;;  %v435_v44 = vadd.f32 %v434_v60, %v719_v26 }
 0x179   :  { %v444_v10 = vmax.f32 %v406_v63, 0.0  ;;  %v445_v13 = vmax.f32 %v435_v44, 0.0 }
 0x17e   :  { %v408_v61 = vpop.f32.mrf.mxu2  ;;  %v437_v62 = vpop.f32.mrf.mxu3 }
 0x17f   :  { %v409_v0 = vadd.f32 %v408_v61, %v715_v24  ;;  %v438_v2 = vadd.f32 %v437_v62, %v715_v24 }
 0x181   :  { %v446_v6 = vmax.f32 %v409_v0, 0.0  ;;  %v447_v7 = vmax.f32 %v438_v2, 0.0 }
 0x183   :  { %460 = vmatpush.msrb.mxu0 %v446_v6  ;;  %480 = vmatpush.msrb.mxu1 %v447_v7 }
 0x185   :  { %461 = vmatpush.msrb.mxu0 %v444_v10  ;;  %481 = vmatpush.msrb.mxu1 %v445_v13 }
 0x187   :  { %462 = vmatpush.msrb.mxu0 %v442_v14  ;;  %482 = vmatpush.msrb.mxu1 %v443_v15 }
 0x189   :  { %463 = vmatpush.msrb.mxu0 %v440_v17  ;;  %483 = vmatpush.msrb.mxu1 %v441_v18 }
 0x18a   :  { %541 = vmatmul.msk.f32.vlgmr.msrb.gmra.mxu1 %vm236_vm2, %v28_v47  ;;  %540 = vmatmul.msk.f32.vlgmr.msrb.gmra.mxu0 %vm236_vm2, %v28_v47 }
 0x207   :  { %v485_v19 = vpop.f32.mrf.mxu1  ;;  %v465_v20 = vpop.f32.mrf.mxu0 }
 0x208   :  { %v486_v21 = vadd.f32 %v485_v19, %v234_v51  ;;  %v466_v23 = vadd.f32 %v465_v20, %v234_v51 }
 0x20a   :  { %v490_v22 = vrot.slane %v486_v21, 4 }
 0x20c   :  { %v491_v24 = vsel %vm43_vm0, %v466_v23, %v490_v22 }
 0x20d   :  { %494 = vst [vmem:[#allocation2 + $0x8] sm:$0xff] %v491_v24 }
 0x20e   :  { %507 = dma.vmem_to_hbm [thread:$0]  %s500_s5, 256, %s502_s25, [#allocation3], %s577_s26, %s577_s26, %s578_s27  }
 0x20f   :  { %573 = dma.done.wait [#allocation3], 256  }
 0x210   :  { %574 = vsyncadd [#allocation3], 4294967040 }
 0x211   :  { %512 = vsyncpa [#allocation3], 1 }

</bundles_post_ra>
